<compile_context>
chip_gen: v7x
topology: tpu7x:2x2x1
jax: 0.10.0
libtpu: 0.0.40
codegen_flags: <defaults>
</compile_context>

<pallas_src>
import jax
import jax.numpy as jnp
from jax.experimental import pallas as pl
from jax.experimental.pallas import tpu as pltpu


def _round_up(x, m):
    return ((x + m - 1) // m) * m


def dae_forward_kernel(x_ref, w_ref, b_ref, o_ref, acc_ref):
    """One (i, j, k) grid step of ReLU(x @ W_t + b).

    x_ref: (tm, tk) bf16   w_ref: (tk, tn) bf16   b_ref: (1, tn) f32
    o_ref: (tm, tn) out    acc_ref: (tm, tn) f32 VMEM scratch
    """
    k = pl.program_id(2)

    @pl.when(k == 0)
    def _():
        acc_ref[...] = jnp.zeros_like(acc_ref)

    acc_ref[...] += jnp.dot(x_ref[...], w_ref[...],
                            preferred_element_type=jnp.float32)

    @pl.when(k == pl.num_programs(2) - 1)
    def _():
        y = acc_ref[...] + b_ref[...]          # (1, tn) broadcast over rows
        o_ref[...] = jnp.maximum(y, 0.0).astype(o_ref.dtype)


def _dae_forward_padded(x_pad, w_t_pad, b_pad, *, tm, tn, tk, out_dtype):
    m_pad, k_pad = x_pad.shape
    _, n_pad = w_t_pad.shape
    grid = (m_pad // tm, n_pad // tn, k_pad // tk)
    return pl.pallas_call(
        dae_forward_kernel,
        out_shape=jax.ShapeDtypeStruct((m_pad, n_pad), out_dtype),
        grid_spec=pltpu.PrefetchScalarGridSpec(
            num_scalar_prefetch=0,
            grid=grid,
            in_specs=[
                pl.BlockSpec((tm, tk), lambda i, j, k: (i, k)),
                pl.BlockSpec((tk, tn), lambda i, j, k: (k, j)),
                pl.BlockSpec((1, tn), lambda i, j, k: (0, j)),
            ],
            out_specs=pl.BlockSpec((tm, tn), lambda i, j, k: (i, j)),
            scratch_shapes=[pltpu.VMEM((tm, tn), jnp.float32)],
        ),
        compiler_params=pltpu.CompilerParams(
            dimension_semantics=("parallel", "parallel", "arbitrary")),
    )(x_pad, w_t_pad, b_pad)


class DenoisingAutoEncoderForward:
    """Pallas equivalent of DenoisingAutoEncoder.forward = ReLU(Linear(x)).

    weight: (output_size, input_size) -- PyTorch nn.Linear convention
    bias:   (output_size,)

    The weight transpose, bf16 cast and lane padding are done ONCE here
    (parameter-load time); __call__ only pads/casts the activation.
    """

    TM_CAP = 256   # rows per tile (multiple of 8)
    TN_CAP = 256   # output features per tile (multiple of 128, MXU-native)
    TK_CAP = 512   # contraction per tile (multiple of 128)

    def __init__(self, weight, bias, *, out_dtype=jnp.float32):
        out_features, in_features = weight.shape
        assert bias.shape == (out_features,)
        self.in_features = in_features
        self.out_features = out_features
        self.out_dtype = out_dtype

        self.tn = min(self.TN_CAP, _round_up(out_features, 128))
        self.tk = min(self.TK_CAP, _round_up(in_features, 128))
        n_pad = _round_up(out_features, self.tn)
        k_pad = _round_up(in_features, self.tk)

        # Hoisted out of the per-call path: transpose -> (K, N), zero-pad to
        # (k_pad, n_pad), cast to bf16 for MXU throughput.
        w_t = jnp.transpose(weight).astype(jnp.float32)
        w_t = jnp.pad(w_t, ((0, k_pad - in_features), (0, n_pad - out_features)))
        self.w_t = w_t.astype(jnp.bfloat16)
        b = jnp.pad(bias.astype(jnp.float32), (0, n_pad - out_features))
        self.b = b.reshape(1, n_pad)

        self._fwd = jax.jit(self._forward)

    def _forward(self, x):
        m, k = x.shape
        assert k == self.in_features
        tm = min(self.TM_CAP, _round_up(m, 8))
        m_pad = _round_up(m, tm)
        k_pad = self.w_t.shape[0]
        x_pad = jnp.pad(x, ((0, m_pad - m), (0, k_pad - k))).astype(jnp.bfloat16)
        out = _dae_forward_padded(x_pad, self.w_t, self.b,
                                  tm=tm, tn=self.tn, tk=self.tk,
                                  out_dtype=self.out_dtype)
        return out[:m, :self.out_features]

    def __call__(self, x):
        return self._fwd(x)


if __name__ == "__main__":
    key = jax.random.PRNGKey(0)

    def make_params(k, in_features, out_features):
        kw, kb = jax.random.split(k)
        bound = 1.0 / (in_features ** 0.5)
        weight = jax.random.uniform(kw, (out_features, in_features),
                                    minval=-bound, maxval=bound,
                                    dtype=jnp.float32)
        bias = jax.random.uniform(kb, (out_features,),
                                  minval=-bound, maxval=bound,
                                  dtype=jnp.float32)
        return weight, bias

    def reference(x, weight, bias):
        # Same bf16-operand / f32-accumulate numerics the kernel uses.
        y = jnp.dot(x.astype(jnp.bfloat16), weight.T.astype(jnp.bfloat16),
                    preferred_element_type=jnp.float32)
        return jnp.maximum(y + bias.astype(jnp.float32), 0.0)

    k1, k2, k3, k4 = jax.random.split(key, 4)

    # Case 1: module-sized small demo (input_size=32, output_size=64, batch=8)
    w1, b1 = make_params(k1, 32, 64)
    x1 = jax.random.normal(k2, (8, 32), dtype=jnp.float32)
    dae1 = DenoisingAutoEncoderForward(w1, b1)
    out1 = jax.block_until_ready(dae1(x1))
    ref1 = reference(x1, w1, b1)
    assert out1.shape == (8, 64)
    assert jnp.allclose(out1, ref1, atol=1e-3, rtol=1e-3)

    # Case 2: unaligned shapes exercising padding, K-accumulation and M tiling
    w2, b2 = make_params(k3, 600, 160)
    x2 = jax.random.normal(k4, (300, 600), dtype=jnp.float32)
    dae2 = DenoisingAutoEncoderForward(w2, b2)
    out2 = jax.block_until_ready(dae2(x2))
    ref2 = reference(x2, w2, b2)
    assert out2.shape == (300, 160)
    assert jnp.allclose(out2, ref2, atol=1e-3, rtol=1e-3)

    print("KERNEL_OK")
</pallas_src>

<mosaic_0001>
module attributes {stable_mosaic.version = 11 : i64} {
  func.func @dae_forward_kernel(%arg0: i32, %arg1: i32, %arg2: i32, %arg3: memref<8x128xbf16, #tpu.memory_space<vmem>>, %arg4: memref<128x128xbf16, #tpu.memory_space<vmem>>, %arg5: memref<1x128xf32, #tpu.memory_space<vmem>>, %arg6: memref<8x128xf32, #tpu.memory_space<vmem>>, %arg7: memref<8x128xf32, #tpu.memory_space<vmem>>) attributes {dimension_semantics = [#tpu.dimension_semantics<parallel>, #tpu.dimension_semantics<parallel>, #tpu.dimension_semantics<arbitrary>], iteration_bounds = array<i64: 1, 1, 1>, scalar_prefetch = 0 : i64, scratch_operands = 1 : i64, tpu.core_type = #tpu.core_type<tc>, window_params = [{transform_indices = @transform_0, window_bounds = array<i64: 8, 128>}, {transform_indices = @transform_1, window_bounds = array<i64: 128, 128>}, {transform_indices = @transform_2, window_bounds = array<i64: 1, 128>}, {transform_indices = @transform_3, window_bounds = array<i64: 8, 128>}]} {
    %c0_i32 = arith.constant 0 : i32
    %0 = arith.cmpi eq, %arg2, %c0_i32 : i32
    %1 = arith.extui %0 : i1 to i32
    %c0_i32_0 = arith.constant 0 : i32
    %2 = arith.cmpi ne, %1, %c0_i32_0 : i32
    scf.if %2 {
      %cst_10 = arith.constant 0.000000e+00 : f32
      %12 = vector.broadcast %cst_10 : f32 to vector<8x128xf32>
      %c0_11 = arith.constant 0 : index
      %c0_12 = arith.constant 0 : index
      %13 = vector.load %arg7[%c0_11, %c0_12] : memref<8x128xf32, #tpu.memory_space<vmem>>, vector<8x128xf32>
      tpu.vector_store %arg7[%c0_11, %c0_12], %12 {strides = array<i32>} : memref<8x128xf32, #tpu.memory_space<vmem>>, vector<8x128xf32>,
    } else {
    }
    %c0 = arith.constant 0 : index
    %c0_1 = arith.constant 0 : index
    %3 = vector.load %arg7[%c0, %c0_1] : memref<8x128xf32, #tpu.memory_space<vmem>>, vector<8x128xf32>
    %c0_2 = arith.constant 0 : index
    %c0_3 = arith.constant 0 : index
    %4 = vector.load %arg3[%c0_2, %c0_3] : memref<8x128xbf16, #tpu.memory_space<vmem>>, vector<8x128xbf16>
    %c0_4 = arith.constant 0 : index
    %c0_5 = arith.constant 0 : index
    %5 = vector.load %arg4[%c0_4, %c0_5] : memref<128x128xbf16, #tpu.memory_space<vmem>>, vector<128x128xbf16>
    %cst = arith.constant dense<0.000000e+00> : vector<8x128xf32>
    %6 = tpu.matmul %4, %5, %cst {dimension_numbers = #tpu.dot_dimension_numbers<[1], [0], [0], [1], [0, 0, 1, 1], [], []>} : vector<8x128xbf16>, vector<128x128xbf16>, vector<8x128xf32> -> vector<8x128xf32>
    %7 = arith.addf %3, %6 : vector<8x128xf32>
    %c0_6 = arith.constant 0 : index
    %c0_7 = arith.constant 0 : index
    %8 = vector.load %arg7[%c0_6, %c0_7] : memref<8x128xf32, #tpu.memory_space<vmem>>, vector<8x128xf32>
    tpu.vector_store %arg7[%c0_6, %c0_7], %7 {strides = array<i32>} : memref<8x128xf32, #tpu.memory_space<vmem>>, vector<8x128xf32>,
    %c0_i32_8 = arith.constant 0 : i32
    %9 = arith.cmpi eq, %arg2, %c0_i32_8 : i32
    %10 = arith.extui %9 : i1 to i32
    %c0_i32_9 = arith.constant 0 : i32
    %11 = arith.cmpi ne, %10, %c0_i32_9 : i32
    scf.if %11 {
      %c0_10 = arith.constant 0 : index
      %c0_11 = arith.constant 0 : index
      %12 = vector.load %arg7[%c0_10, %c0_11] : memref<8x128xf32, #tpu.memory_space<vmem>>, vector<8x128xf32>
      %c0_12 = arith.constant 0 : index
      %c0_13 = arith.constant 0 : index
      %13 = vector.load %arg5[%c0_12, %c0_13] : memref<1x128xf32, #tpu.memory_space<vmem>>, vector<1x128xf32>
      %14 = vector.broadcast %13 : vector<1x128xf32> to vector<8x128xf32>
      %15 = arith.addf %12, %14 : vector<8x128xf32>
      %cst_14 = arith.constant 0.000000e+00 : f32
      %16 = vector.broadcast %cst_14 : f32 to vector<8x128xf32>
      %17 = arith.maximumf %15, %16 : vector<8x128xf32>
      %c0_15 = arith.constant 0 : index
      %c0_16 = arith.constant 0 : index
      %18 = vector.load %arg6[%c0_15, %c0_16] : memref<8x128xf32, #tpu.memory_space<vmem>>, vector<8x128xf32>
      tpu.vector_store %arg6[%c0_15, %c0_16], %17 {strides = array<i32>} : memref<8x128xf32, #tpu.memory_space<vmem>>, vector<8x128xf32>,
    } else {
    }
    return
  }
  func.func @transform_0(%arg0: i32, %arg1: i32, %arg2: i32) -> (i32, i32) {
    %c0_i32 = arith.constant 0 : i32
    return %arg0, %arg2 : i32, i32
  }
  func.func @transform_1(%arg0: i32, %arg1: i32, %arg2: i32) -> (i32, i32) {
    %c0_i32 = arith.constant 0 : i32
    return %arg2, %arg1 : i32, i32
  }
  func.func @transform_2(%arg0: i32, %arg1: i32, %arg2: i32) -> (i32, i32) {
    %c0_i32 = arith.constant 0 : i32
    %c0_i32_0 = arith.constant 0 : i32
    return %c0_i32, %arg1 : i32, i32
  }
  func.func @transform_3(%arg0: i32, %arg1: i32, %arg2: i32) -> (i32, i32) {
    %c0_i32 = arith.constant 0 : i32
    return %arg0, %arg1 : i32, i32
  }
}

</mosaic_0001>

<bundles_post_ra>
// kernel: _forward.1
= control target key start
LH: loop header
LB: loop body
LE: loop exit
PB: predicated region body
PF: predicated region fallthrough
CT: control target
= control target key end

     0   :  { %8 = vsyncpa [#allocation4], 0  ;;  %s328_s0 = inlined_call_operand.vmem [shape: bf16[8,128], index: 0, kind: input, shape index: {}]   ;;  %s329_s1 = inlined_call_operand.hbm [shape: bf16[128,128], index: 1, kind: input, shape index: {}]   ;;  %s330_s2 = inlined_call_operand.vmem [shape: f32[1,128], index: 2, kind: input, shape index: {}]   ;;  %s331_s3 = inlined_call_operand.hbm [shape: f32[8,128], index: 3, kind: output, shape index: {}]  }
   0x1   :  { %9 = vsyncpa [#allocation5], 0  ;;  %s272_s12 = smov [#allocation3]   ;;  %s224_s16 = scalar_lea.hbm %s329_s1, 1024 }
   0x2   :  { %s17_s13 = sshll.u32 %s272_s12, 4  ;;  %p225_p0 = scmp.ne.s32.totalorder %s329_s1, %s224_s16  ;;  %s18_s13 = int_to_ptr.vmem [resolvable:$true] %s17_s13 }
   0x3   :  { %p228_p1 = scmp.lt.u32.totalorder %s224_s16, %s329_s1 }
   0x5   :  { %p230_p2 = pnand %p228_p1, %p225_p0 }
   0x7   :  { %233 = shalt.err (!%p230_p2)
}
   0x8   :  { %s234_s21 = scalar_lea.vmem %s18_s13, 1024  ;;  %p239_p4 = scmp.lt.s32.totalorder %s18_s13, %s18_s13 }
   0x9   :  { %p235_p3 = scmp.ne.s32.totalorder %s18_s13, %s234_s21  ;;  %p240_p5 = scmp.lt.s32.totalorder %s234_s21, %s234_s21 }
   0xb   :  { %p241_p6 = por %p240_p5, %p239_p4 }
   0xd   :  { %p242_p7 = pnand %p241_p6, %p235_p3 }
   0xf   :  { %245 = shalt.err (!%p242_p7)
}
  0x10   :  { %s273_s22 = smov 64   ;;  %s274_s23 = smov 4  }
  0x11   :  { %23 = dma.hbm_to_vmem [thread:$0]  %s329_s1, 1024, %s18_s13, [#allocation4], %s273_s22, %s273_s22, %s274_s23  }
  0x12   :  { %268 = dma.done.wait [#allocation4], 1024  }
  0x13   :  { %269 = vsyncadd [#allocation4], 4294966272  ;;  %v275_v0 = vmov 0.0   ;;  %vm276_vm0 = vmmov 0   ;;  %v216_v1 = vld [vmem:[#allocation3] sm:$0xff]   ;;  %v217_v2 = vld [vmem:[#allocation3 + $0x8] sm:$0xff]  }
  0x14   :  { %190 = vmatprep.subr.bf16.mxu0 %v275_v0  ;;  %206 = vmatprep.mubr.msk.bf16.mxu0 %vm276_vm0, %v275_v0  ;;  %v218_v3 = vld [vmem:[#allocation3 + $0x10] sm:$0xff]   ;;  %v219_v4 = vld [vmem:[#allocation3 + $0x18] sm:$0xff]   ;;  %v220_v5 = vld [vmem:[#allocation3 + $0x20] sm:$0xff]   ;;  %s277_s29 = smov [#allocation6]  }
  0x15   :  { %191 = vmatpush3.bf16.msra.mxu0 %v216_v1  ;;  %v221_v6 = vld [vmem:[#allocation3 + $0x28] sm:$0xff]   ;;  %v222_v7 = vld [vmem:[#allocation3 + $0x30] sm:$0xff]   ;;  %v223_v8 = vld [vmem:[#allocation3 + $0x38] sm:$0xff]   ;;  %s163_s30 = sshll.u32 %s277_s29, 4  ;;  %s164_s30 = int_to_ptr.vmem [resolvable:$true] %s163_s30 }
  0x16   :  { %192 = vmatprep.subr.bf16.mxu0 %v275_v0  ;;  %v36_v9 = vld [vmem:[%s328_s0] sm:$0xf]  ;;  %s246_s4 = scalar_lea.vmem %s164_s30, 128  ;;  %p251_p9 = scmp.lt.s32.totalorder %s164_s30, %s164_s30 }
  0x17   :  { %v180_v10 = vld [vmem:[%s330_s2] ss:$0 sm:$0xff]  ;;  %p247_p8 = scmp.ne.s32.totalorder %s164_s30, %s246_s4  ;;  %p252_p10 = scmp.lt.s32.totalorder %s246_s4, %s246_s4 }
  0x19   :  { %193 = vmatpush3.bf16.msra.mxu0 %v217_v2  ;;  %p253_p11 = por %p252_p10, %p251_p9 }
  0x1a   :  { %194 = vmatprep.subr.bf16.mxu0 %v275_v0 }
  0x1b   :  { %p254_p12 = pnand %p253_p11, %p247_p8 }
  0x1d   :  { %195 = vmatpush3.bf16.msra.mxu0 %v218_v3 }
  0x1e   :  { %196 = vmatprep.subr.bf16.mxu0 %v275_v0 }
  0x21   :  { %197 = vmatpush3.bf16.msra.mxu0 %v219_v4 }
  0x22   :  { %198 = vmatprep.subr.bf16.mxu0 %v275_v0 }
  0x25   :  { %199 = vmatpush3.bf16.msra.mxu0 %v220_v5 }
  0x26   :  { %200 = vmatprep.subr.bf16.mxu0 %v275_v0 }
  0x29   :  { %201 = vmatpush3.bf16.msra.mxu0 %v221_v6 }
  0x2a   :  { %202 = vmatprep.subr.bf16.mxu0 %v275_v0 }
  0x2d   :  { %203 = vmatpush3.bf16.msra.mxu0 %v222_v7 }
  0x2e   :  { %204 = vmatprep.subr.bf16.mxu0 %v275_v0 }
  0x31   :  { %205 = vmatpush3.bf16.msra.mxu0 %v223_v8 }
  0x34   :  { %207 = vmatmul.mubr.bf16.vlgmr.msra.gmra.mrb[0].mxu0 %v36_v9 }
 0x107   :  { %v135_v11 = vpop.f32.mrb[0].mxu0 }
 0x108   :  { %v154_v12 = vadd.f32 %v180_v10, %v135_v11  ;;  %v208_v13 = vpop.f32.mrb[1].mxu0 }
 0x109   :  { %v138_v14 = vpop.f32.mrb[2].mxu0 }
 0x10a   :  { %v155_v15 = vmax.f32 %v154_v12, 0.0  ;;  %v209_v16 = vpop.f32.mrb[3].mxu0 }
 0x10c   :  { %156 = vst [vmem:[#allocation6] sm:$0xff] %v155_v15 }
 0x10d   :  { %257 = shalt.err (!%p254_p12)
}
 0x10e   :  { %s258_s2 = scalar_lea.hbm %s331_s3, 128 }
 0x10f   :  { %p259_p13 = scmp.ne.s32.totalorder %s331_s3, %s258_s2  ;;  %p262_p0 = scmp.lt.u32.totalorder %s258_s2, %s331_s3 }
 0x111   :  { %p264_p1 = pnand %p262_p0, %p259_p13 }
 0x113   :  { %267 = shalt.err (!%p264_p1)
}
 0x114   :  { %166 = dma.vmem_to_hbm [thread:$0]  %s164_s30, 128, %s331_s3, [#allocation5]  }
 0x115   :  { %270 = dma.done.wait [#allocation5], 128  }
 0x116   :  { %271 = vsyncadd [#allocation5], 4294967168 }
 0x117   :  { %170 = vsyncpa [#allocation4], 1 }
 0x118   :  { %171 = vsyncpa [#allocation5], 1 }

</bundles_post_ra>
